<compile_context>
chip_gen: v6e
topology: v6e:2x2x1
jax: 0.10.0
libtpu: 0.0.40
codegen_flags: <defaults>
</compile_context>

<pallas_src>
import math
import functools

import jax
import jax.numpy as jnp
from jax.experimental import pallas as pl
from jax.experimental.pallas import tpu as pltpu

EPS = 1e-5  # config.classifier_layer_norm_eps
_INV_SQRT2 = 1.0 / math.sqrt(2.0)


def _round_up(x, m):
    return (x + m - 1) // m * m


def _cdiv(a, b):
    return (a + b - 1) // b


# Generation-aware VMEM capacity, queried once outside jit.
# v5e/v6e: 128 MiB per core; v7x: 64 MiB per TensorCore.
try:
    _VMEM_CAP = int(pltpu.get_tpu_info().vmem_capacity_bytes)
except Exception:  # non-TPU backend / older runtime: most conservative figure
    _VMEM_CAP = 64 << 20
_VMEM_BUDGET_CAP = max(_VMEM_CAP - (8 << 20), 16 << 20)  # leave headroom


def _layer_norm_no_affine(x, eps):
    # PyTorch LayerNorm(elementwise_affine=False): biased variance over last
    # dim.  Single-pass: var = E[x^2] - mu^2 (clamped), so the two cross-lane
    # reductions are independent instead of serialized.
    mu = jnp.mean(x, axis=-1, keepdims=True)
    mu2 = jnp.mean(x * x, axis=-1, keepdims=True)
    var = jnp.maximum(mu2 - mu * mu, 0.0)
    return (x - mu) * jax.lax.rsqrt(var + eps)


def classifier_head_kernel(x_ref, w1_ref, b1_ref, w2_ref, b2_ref, out_ref):
    # x_ref: (tb, D) pooled token-0 activations in the backbone's dtype.
    x = x_ref[...].astype(jnp.float32)

    # LayerNorm (no affine) -- f32 on VPU/EUP
    h = _layer_norm_no_affine(x, EPS)

    # Linear(D, D): bf16 operands into the MXU, f32 accumulation
    h = jnp.dot(h.astype(w1_ref.dtype), w1_ref[...],
                preferred_element_type=jnp.float32) + b1_ref[...]

    # GELU (nn.GELU default = exact erf form) -- erf goes to the EUP slot
    h = 0.5 * h * (1.0 + jax.lax.erf(h * _INV_SQRT2))

    # LayerNorm (no affine)
    h = _layer_norm_no_affine(h, EPS)

    # nn.Dropout(classifier_dropout): identity in eval mode
    # TODO(synk): training-mode dropout (random mask + 1/(1-p) scaling) not implemented.

    # Linear(D, num_labels_padded): lane-dense 128-wide output
    out = jnp.dot(h.astype(w2_ref.dtype), w2_ref[...],
                  preferred_element_type=jnp.float32) + b2_ref[...]
    out_ref[...] = out.astype(out_ref.dtype)


@functools.partial(jax.jit, static_argnames=("tile_b", "weights_dtype"))
def classifier_head(encodings, w1, b1, w2, b2, *, tile_b=None,
                    weights_dtype=jnp.bfloat16):
    """encodings: (B, S, D); returns logits (B, num_labels) f32.

    Weights are the pre-transposed (in, out) layouts of the PyTorch Linears
    (so the kernel computes x @ W + b == x @ W_pt.T + b).
    """
    B, S, D = encodings.shape
    num_labels = w2.shape[1]

    # Token selection (take_final=False, enc_dec=False): encoding[:, 0].
    # Kept in the backbone's native dtype (bf16 in practice) so the per-tile
    # activation DMA is half the f32 size; the kernel upcasts to f32 on-chip.
    # TODO(synk): fuse this gather into the kernel with a (tb, 1, D) BlockSpec
    # once sub-(8,128) second-minor blocks are guaranteed on all generations.
    pooled = encodings[:, 0, :]                                   # (B, D)

    # Lane-dense output: zero-pad num_labels up to a multiple of 128.
    n_pad = _round_up(num_labels, 128)
    w2p = jnp.zeros((D, n_pad), jnp.float32).at[:, :num_labels].set(
        w2.astype(jnp.float32))
    b2p = jnp.zeros((1, n_pad), jnp.float32).at[:, :num_labels].set(
        b2.reshape(1, -1).astype(jnp.float32))

    # bf16 weights (half the HBM/VMEM bytes); biases stay f32 for the VPU adds.
    # TODO(synk): for very large D (>~6k) column-stream w1 with a second grid
    # axis instead of keeping it fully resident.
    w1c = w1.astype(weights_dtype)
    w2c = w2p.astype(weights_dtype)
    b1c = b1.reshape(1, -1).astype(jnp.float32)
    b2c = b2p

    # Batch tiling: at least 2 (even) tiles whenever B allows it so both v7x
    # TensorCores get work; tiles are multiples of 16 rows (bf16 packing) and
    # sized to minimize last-tile padding.
    if tile_b is None:
        tile_b = 256 if _VMEM_CAP <= (64 << 20) else 512
    n_tiles = max(2, _cdiv(B, tile_b))
    if n_tiles % 2:
        n_tiles += 1
    tb = max(16, _round_up(_cdiv(B, n_tiles), 16))
    b_pad = _round_up(B, tb)
    if b_pad != B:
        pooled = jnp.pad(pooled, ((0, b_pad - B), (0, 0)))
    grid = (b_pad // tb,)

    # Explicit VMEM budget: double-buffered activation/output tiles,
    # single-buffered (Buffered(1)) resident weights/biases.
    w_item = jnp.dtype(weights_dtype).itemsize
    x_item = jnp.dtype(pooled.dtype).itemsize
    vmem_bytes = (2 * tb * D * x_item            # pooled tile, double-buffered
                  + 2 * tb * n_pad * 4           # output tile, double-buffered
                  + (D * D + D * n_pad) * w_item # weights, single copy
                  + (D + n_pad) * 4)             # biases, single copy
    vmem_bytes = min(max(vmem_bytes + (4 << 20), 16 << 20), _VMEM_BUDGET_CAP)

    cost = pl.CostEstimate(
        flops=2 * b_pad * D * (D + n_pad),
        transcendentals=b_pad * D,               # erf per hidden activation
        bytes_accessed=(b_pad * D * x_item + b_pad * n_pad * 4
                        + (D * D + D * n_pad) * w_item + (D + n_pad) * 4),
    )

    resident = pl.Buffered(1)  # constant-index blocks: single VMEM copy

    out = pl.pallas_call(
        classifier_head_kernel,
        out_shape=jax.ShapeDtypeStruct((b_pad, n_pad), jnp.float32),
        grid_spec=pltpu.PrefetchScalarGridSpec(
            num_scalar_prefetch=0,
            grid=grid,
            in_specs=[
                pl.BlockSpec((tb, D), lambda i: (i, 0)),          # pooled tile
                pl.BlockSpec((D, D), lambda i: (0, 0),
                             pipeline_mode=resident),             # w1 resident
                pl.BlockSpec((1, D), lambda i: (0, 0),
                             pipeline_mode=resident),             # b1
                pl.BlockSpec((D, n_pad), lambda i: (0, 0),
                             pipeline_mode=resident),             # w2 (padded)
                pl.BlockSpec((1, n_pad), lambda i: (0, 0),
                             pipeline_mode=resident),             # b2 (padded)
            ],
            out_specs=pl.BlockSpec((tb, n_pad), lambda i: (i, 0)),
        ),
        compiler_params=pltpu.CompilerParams(
            dimension_semantics=("parallel",),   # shard batch tiles across TCs
            vmem_limit_bytes=int(vmem_bytes),
        ),
        cost_estimate=cost,
    )(pooled, w1c, b1c, w2c, b2c)

    return out[:B, :num_labels]


def synthetic_transformer(input_ids, attention_mask, emb_table):
    """Stand-in for the pretrained AutoModel backbone (plain JAX).

    TODO(synk): the pretrained HF transformer (AutoModel.from_pretrained) has no
    Pallas equivalent here; it is replaced by a deterministic embedding lookup
    producing (B, S, D) bf16 encodings so the classifier-head hot path can be
    tested.
    """
    enc = emb_table[input_ids]                                    # (B, S, D)
    if attention_mask is not None:
        enc = enc * attention_mask[..., None].astype(enc.dtype)
    return enc.astype(jnp.bfloat16)   # backbone activations in bf16


def model_for_sequence_classification(input_ids, attention_mask, params):
    enc = synthetic_transformer(input_ids, attention_mask, params["emb_table"])
    return classifier_head(enc, params["w1"], params["b1"],
                           params["w2"], params["b2"])


def _head_reference(encodings, w1, b1, w2, b2, weights_dtype=jnp.bfloat16):
    """Plain-JAX reference with the same mixed precision as the kernel."""
    x = encodings[:, 0, :].astype(jnp.float32)
    h = _layer_norm_no_affine(x, EPS)
    h = jnp.dot(h.astype(weights_dtype), w1.astype(weights_dtype),
                preferred_element_type=jnp.float32) + b1.reshape(1, -1)
    h = 0.5 * h * (1.0 + jax.lax.erf(h * _INV_SQRT2))
    h = _layer_norm_no_affine(h, EPS)
    return (jnp.dot(h.astype(weights_dtype), w2.astype(weights_dtype),
                    preferred_element_type=jnp.float32) + b2.reshape(1, -1))


if __name__ == "__main__":
    B, S, D, VOCAB, NUM_LABELS = 2, 8, 32, 100, 4

    key = jax.random.PRNGKey(0)
    k_emb, k_ids, k_w1, k_b1, k_w2, k_b2 = jax.random.split(key, 6)

    # nn.Linear-style uniform init bounds 1/sqrt(fan_in)
    bound1 = 1.0 / math.sqrt(D)
    params = {
        "emb_table": 0.02 * jax.random.normal(k_emb, (VOCAB, D), jnp.float32),
        "w1": jax.random.uniform(k_w1, (D, D), jnp.float32, -bound1, bound1),
        "b1": jax.random.uniform(k_b1, (1, D), jnp.float32, -bound1, bound1),
        "w2": jax.random.uniform(k_w2, (D, NUM_LABELS), jnp.float32, -bound1, bound1),
        "b2": jax.random.uniform(k_b2, (1, NUM_LABELS), jnp.float32, -bound1, bound1),
    }

    input_ids = jax.random.randint(k_ids, (B, S), 0, VOCAB)
    attention_mask = jnp.ones((B, S), jnp.float32)

    logits = model_for_sequence_classification(input_ids, attention_mask, params)
    jax.block_until_ready(logits)

    assert logits.shape == (B, NUM_LABELS), logits.shape
    assert logits.dtype == jnp.float32

    # Correctness check vs plain-JAX mixed-precision reference.
    # NOTE: weights are bf16 into the MXU (f32 accumulation); parity vs the
    # fully-f32 PyTorch head degrades ~sqrt(D) and is not asserted here.
    enc = synthetic_transformer(input_ids, attention_mask, params["emb_table"])
    ref = _head_reference(enc, params["w1"], params["b1"],
                          params["w2"], params["b2"])
    max_err = float(jnp.max(jnp.abs(logits - ref)))
    assert max_err < 1e-3, f"max abs error {max_err}"

    print("KERNEL_OK")
</pallas_src>

<mosaic_0001>
module attributes {stable_mosaic.version = 11 : i64} {
  func.func @classifier_head_kernel(%arg0: i32, %arg1: memref<16x32xbf16, #tpu.memory_space<vmem>>, %arg2: memref<32x32xbf16, #tpu.memory_space<vmem>>, %arg3: memref<1x32xf32, #tpu.memory_space<vmem>>, %arg4: memref<32x128xbf16, #tpu.memory_space<vmem>>, %arg5: memref<1x128xf32, #tpu.memory_space<vmem>>, %arg6: memref<16x128xf32, #tpu.memory_space<vmem>>) attributes {dimension_semantics = [#tpu.dimension_semantics<parallel>], iteration_bounds = array<i64: 1>, scalar_prefetch = 0 : i64, scratch_operands = 0 : i64, tpu.core_type = #tpu.core_type<tc>, window_params = [{transform_indices = @transform_0, window_bounds = array<i64: 16, 32>}, {pipeline_mode = #tpu.pipeline_mode<synchronous>, transform_indices = @transform_1, window_bounds = array<i64: 32, 32>}, {pipeline_mode = #tpu.pipeline_mode<synchronous>, transform_indices = @transform_2, window_bounds = array<i64: 1, 32>}, {pipeline_mode = #tpu.pipeline_mode<synchronous>, transform_indices = @transform_3, window_bounds = array<i64: 32, 128>}, {pipeline_mode = #tpu.pipeline_mode<synchronous>, transform_indices = @transform_4, window_bounds = array<i64: 1, 128>}, {transform_indices = @transform_5, window_bounds = array<i64: 16, 128>}]} {
    %c0 = arith.constant 0 : index
    %c0_0 = arith.constant 0 : index
    %0 = vector.load %arg1[%c0, %c0_0] : memref<16x32xbf16, #tpu.memory_space<vmem>>, vector<16x32xbf16>
    %1 = arith.extf %0 : vector<16x32xbf16> to vector<16x32xf32>
    %cst = arith.constant dense<0.000000e+00> : vector<16xf32>
    %2 = vector.multi_reduction <add>, %1, %cst [1] : vector<16x32xf32> to vector<16xf32>
    %3 = vector.shape_cast %2 : vector<16xf32> to vector<16x1xf32>
    %cst_1 = arith.constant 3.200000e+01 : f32
    %4 = vector.broadcast %cst_1 : f32 to vector<16x1xf32>
    %5 = arith.divf %3, %4 : vector<16x1xf32>
    %6 = arith.mulf %1, %1 : vector<16x32xf32>
    %cst_2 = arith.constant dense<0.000000e+00> : vector<16xf32>
    %7 = vector.multi_reduction <add>, %6, %cst_2 [1] : vector<16x32xf32> to vector<16xf32>
    %8 = vector.shape_cast %7 : vector<16xf32> to vector<16x1xf32>
    %cst_3 = arith.constant 3.200000e+01 : f32
    %9 = vector.broadcast %cst_3 : f32 to vector<16x1xf32>
    %10 = arith.divf %8, %9 : vector<16x1xf32>
    %11 = arith.mulf %5, %5 : vector<16x1xf32>
    %12 = arith.subf %10, %11 : vector<16x1xf32>
    %cst_4 = arith.constant 0.000000e+00 : f32
    %13 = vector.broadcast %cst_4 : f32 to vector<16x1xf32>
    %14 = arith.maximumf %12, %13 : vector<16x1xf32>
    %15 = vector.broadcast %5 : vector<16x1xf32> to vector<16x32xf32>
    %16 = arith.subf %1, %15 : vector<16x32xf32>
    %cst_5 = arith.constant 9.99999974E-6 : f32
    %17 = vector.broadcast %cst_5 : f32 to vector<16x1xf32>
    %18 = arith.addf %14, %17 : vector<16x1xf32>
    %19 = math.rsqrt %18 : vector<16x1xf32>
    %20 = vector.broadcast %19 : vector<16x1xf32> to vector<16x32xf32>
    %21 = arith.mulf %16, %20 : vector<16x32xf32>
    %22 = arith.truncf %21 : vector<16x32xf32> to vector<16x32xbf16>
    %c0_6 = arith.constant 0 : index
    %c0_7 = arith.constant 0 : index
    %23 = vector.load %arg2[%c0_6, %c0_7] : memref<32x32xbf16, #tpu.memory_space<vmem>>, vector<32x32xbf16>
    %cst_8 = arith.constant dense<0.000000e+00> : vector<16x32xf32>
    %24 = tpu.matmul %22, %23, %cst_8 {dimension_numbers = #tpu.dot_dimension_numbers<[1], [0], [0], [1], [0, 0, 1, 1], [], []>} : vector<16x32xbf16>, vector<32x32xbf16>, vector<16x32xf32> -> vector<16x32xf32>
    %c0_9 = arith.constant 0 : index
    %c0_10 = arith.constant 0 : index
    %25 = vector.load %arg3[%c0_9, %c0_10] : memref<1x32xf32, #tpu.memory_space<vmem>>, vector<1x32xf32>
    %26 = vector.broadcast %25 : vector<1x32xf32> to vector<16x32xf32>
    %27 = arith.addf %24, %26 : vector<16x32xf32>
    %cst_11 = arith.constant 5.000000e-01 : f32
    %28 = vector.broadcast %cst_11 : f32 to vector<16x32xf32>
    %29 = arith.mulf %28, %27 : vector<16x32xf32>
    %cst_12 = arith.constant 0.707106769 : f32
    %30 = vector.broadcast %cst_12 : f32 to vector<16x32xf32>
    %31 = arith.mulf %27, %30 : vector<16x32xf32>
    %32 = math.erf %31 : vector<16x32xf32>
    %cst_13 = arith.constant 1.000000e+00 : f32
    %33 = vector.broadcast %cst_13 : f32 to vector<16x32xf32>
    %34 = arith.addf %33, %32 : vector<16x32xf32>
    %35 = arith.mulf %29, %34 : vector<16x32xf32>
    %cst_14 = arith.constant dense<0.000000e+00> : vector<16xf32>
    %36 = vector.multi_reduction <add>, %35, %cst_14 [1] : vector<16x32xf32> to vector<16xf32>
    %37 = vector.shape_cast %36 : vector<16xf32> to vector<16x1xf32>
    %cst_15 = arith.constant 3.200000e+01 : f32
    %38 = vector.broadcast %cst_15 : f32 to vector<16x1xf32>
    %39 = arith.divf %37, %38 : vector<16x1xf32>
    %40 = arith.mulf %35, %35 : vector<16x32xf32>
    %cst_16 = arith.constant dense<0.000000e+00> : vector<16xf32>
    %41 = vector.multi_reduction <add>, %40, %cst_16 [1] : vector<16x32xf32> to vector<16xf32>
    %42 = vector.shape_cast %41 : vector<16xf32> to vector<16x1xf32>
    %cst_17 = arith.constant 3.200000e+01 : f32
    %43 = vector.broadcast %cst_17 : f32 to vector<16x1xf32>
    %44 = arith.divf %42, %43 : vector<16x1xf32>
    %45 = arith.mulf %39, %39 : vector<16x1xf32>
    %46 = arith.subf %44, %45 : vector<16x1xf32>
    %cst_18 = arith.constant 0.000000e+00 : f32
    %47 = vector.broadcast %cst_18 : f32 to vector<16x1xf32>
    %48 = arith.maximumf %46, %47 : vector<16x1xf32>
    %49 = vector.broadcast %39 : vector<16x1xf32> to vector<16x32xf32>
    %50 = arith.subf %35, %49 : vector<16x32xf32>
    %cst_19 = arith.constant 9.99999974E-6 : f32
    %51 = vector.broadcast %cst_19 : f32 to vector<16x1xf32>
    %52 = arith.addf %48, %51 : vector<16x1xf32>
    %53 = math.rsqrt %52 : vector<16x1xf32>
    %54 = vector.broadcast %53 : vector<16x1xf32> to vector<16x32xf32>
    %55 = arith.mulf %50, %54 : vector<16x32xf32>
    %56 = arith.truncf %55 : vector<16x32xf32> to vector<16x32xbf16>
    %c0_20 = arith.constant 0 : index
    %c0_21 = arith.constant 0 : index
    %57 = vector.load %arg4[%c0_20, %c0_21] : memref<32x128xbf16, #tpu.memory_space<vmem>>, vector<32x128xbf16>
    %cst_22 = arith.constant dense<0.000000e+00> : vector<16x128xf32>
    %58 = tpu.matmul %56, %57, %cst_22 {dimension_numbers = #tpu.dot_dimension_numbers<[1], [0], [0], [1], [0, 0, 1, 1], [], []>} : vector<16x32xbf16>, vector<32x128xbf16>, vector<16x128xf32> -> vector<16x128xf32>
    %c0_23 = arith.constant 0 : index
    %c0_24 = arith.constant 0 : index
    %59 = vector.load %arg5[%c0_23, %c0_24] : memref<1x128xf32, #tpu.memory_space<vmem>>, vector<1x128xf32>
    %60 = vector.broadcast %59 : vector<1x128xf32> to vector<16x128xf32>
    %61 = arith.addf %58, %60 : vector<16x128xf32>
    %c0_25 = arith.constant 0 : index
    %c0_26 = arith.constant 0 : index
    %62 = vector.load %arg6[%c0_25, %c0_26] : memref<16x128xf32, #tpu.memory_space<vmem>>, vector<16x128xf32>
    tpu.vector_store %arg6[%c0_25, %c0_26], %61 {strides = array<i32>} : memref<16x128xf32, #tpu.memory_space<vmem>>, vector<16x128xf32>,
    return
  }
  func.func @transform_0(%arg0: i32) -> (i32, i32) {
    %c0_i32 = arith.constant 0 : i32
    %c0_i32_0 = arith.constant 0 : i32
    return %arg0, %c0_i32 : i32, i32
  }
  func.func @transform_1(%arg0: i32) -> (i32, i32) {
    %c0_i32 = arith.constant 0 : i32
    %c0_i32_0 = arith.constant 0 : i32
    %c0_i32_1 = arith.constant 0 : i32
    return %c0_i32, %c0_i32_0 : i32, i32
  }
  func.func @transform_2(%arg0: i32) -> (i32, i32) {
    %c0_i32 = arith.constant 0 : i32
    %c0_i32_0 = arith.constant 0 : i32
    %c0_i32_1 = arith.constant 0 : i32
    return %c0_i32, %c0_i32_0 : i32, i32
  }
  func.func @transform_3(%arg0: i32) -> (i32, i32) {
    %c0_i32 = arith.constant 0 : i32
    %c0_i32_0 = arith.constant 0 : i32
    %c0_i32_1 = arith.constant 0 : i32
    return %c0_i32, %c0_i32_0 : i32, i32
  }
  func.func @transform_4(%arg0: i32) -> (i32, i32) {
    %c0_i32 = arith.constant 0 : i32
    %c0_i32_0 = arith.constant 0 : i32
    %c0_i32_1 = arith.constant 0 : i32
    return %c0_i32, %c0_i32_0 : i32, i32
  }
  func.func @transform_5(%arg0: i32) -> (i32, i32) {
    %c0_i32 = arith.constant 0 : i32
    %c0_i32_0 = arith.constant 0 : i32
    return %arg0, %c0_i32 : i32, i32
  }
}

</mosaic_0001>

<bundles_post_ra>
// kernel: classifier_head.1
= control target key start
LH: loop header
LB: loop body
LE: loop exit
PB: predicated region body
PF: predicated region fallthrough
CT: control target
= control target key end

     0   :  { %vm25_vm0 = vcmask 261120   ;;  %v295_v9 = vmov 0.0   ;;  %vm296_vm1 = vmmov 0   ;;  %s370_s0 = inlined_call_operand.vmem [shape: bf16[16,32], index: 0, kind: input, shape index: {}]   ;;  %s371_s1 = inlined_call_operand.vmem [shape: bf16[32,32], index: 1, kind: input, shape index: {}]   ;;  %s372_s2 = inlined_call_operand.vmem [shape: f32[1,32], index: 2, kind: input, shape index: {}]   ;;  %s373_s3 = inlined_call_operand.vmem [shape: bf16[32,128], index: 3, kind: input, shape index: {}]   ;;  %s374_s4 = inlined_call_operand.vmem [shape: f32[1,128], index: 4, kind: input, shape index: {}]   ;;  %s375_s5 = inlined_call_operand.vmem [shape: f32[16,128], index: 5, kind: output, shape index: {}]  }
   0x1   :  { %v252_v0 = vld [vmem:[%s370_s0] sm:$0xff]   ;;  %261 = vmatprep.subr.bf16.mxu0 %v295_v9  ;;  %v279_v10 = vld [vmem:[%s371_s1 + $0x8] sm:$0xff]   ;;  %265 = vmatprep.mubr.msk.bf16.mxu0 %vm296_vm1, %v295_v9 }
   0x2   :  { %v253_v1 = vunpack.c.l.bf16 %v252_v0  ;;  %v254_v2 = vunpack.c.h.bf16 %v252_v0  ;;  %269 = vmatprep.subr.bf16.mxu1 %v295_v9  ;;  %273 = vmatprep.mubr.msk.bf16.mxu1 %vm296_vm1, %v295_v9  ;;  %v280_v11 = vld [vmem:[%s371_s1] sm:$0xff]   ;;  %v281_v58 = vld [vmem:[%s373_s3 + $0x8] sm:$0xff]  }
   0x3   :  { %262 = vmatpush3.bf16.msra.mxu0 %v279_v10  ;;  %v243_v35 = vld [vmem:[%s372_s2] ss:$0 sm:$0xff]  ;;  %270 = vmatpush3.bf16.msra.mxu1 %v281_v58 }
   0x4   :  { %v26_v3 = vsel %vm25_vm0, %v253_v1, 0.0  ;;  %v35_v4 = vmul.f32 %v253_v1, %v253_v1  ;;  %v36_v5 = vmul.f32 %v254_v2, %v254_v2  ;;  %v29_v7 = vsel %vm25_vm0, %v254_v2, 0.0  ;;  %263 = vmatprep.subr.bf16.mxu0 %v295_v9  ;;  %v282_v59 = vld [vmem:[%s373_s3] sm:$0xff]   ;;  %271 = vmatprep.subr.bf16.mxu1 %v295_v9 }
   0x5   :  { %27 = vadd.xlane.f32.xlu0 %v26_v3 }
   0x6   :  { %v37_v6 = vsel %vm25_vm0, %v35_v4, 0.0  ;;  %v40_v8 = vsel %vm25_vm0, %v36_v5, 0.0 }
   0x7   :  { %38 = vadd.xlane.f32.xlu1 %v37_v6  ;;  %264 = vmatpush3.bf16.msra.mxu0 %v280_v11 }
   0x8   :  { %272 = vmatpush3.bf16.msra.mxu1 %v282_v59 }
   0x9   :  { %30 = vadd.xlane.f32.xlu0 %v29_v7 }
   0xb   :  { %41 = vadd.xlane.f32.xlu1 %v40_v8 }
  0x8e   :  { %v28_v12 = vpop.xlane.xlu0 %27 }
  0x8f   :  { %v33_v13 = vmul.f32 0.03125, %v28_v12 }
  0x90   :  { %v39_v14 = vpop.xlane.xlu1 %38 }
  0x91   :  { %v45_v15 = vmul.f32 %v33_v13, %v33_v13  ;;  %v43_v16 = vmul.f32 0.03125, %v39_v14  ;;  %v51_v29 = vsub.f32 %v253_v1, %v33_v13 }
  0x92   :  { %v31_v17 = vpop.xlane.xlu0 %30 }
  0x93   :  { %v47_v18 = vsub.f32 %v43_v16, %v45_v15  ;;  %v34_v19 = vmul.f32 0.03125, %v31_v17 }
  0x94   :  { %v42_v20 = vpop.xlane.xlu1 %41 }
  0x95   :  { %v49_v21 = vmax.f32 %v47_v18, 0.0  ;;  %v46_v22 = vmul.f32 %v34_v19, %v34_v19  ;;  %v44_v23 = vmul.f32 0.03125, %v42_v20  ;;  %v52_v30 = vsub.f32 %v254_v2, %v34_v19  ;;  %v247_v19 = vld [vmem:[%s374_s4] ss:$0 sm:$0xff] }
  0x97   :  { %v53_v24 = vadd.f32 1e-05, %v49_v21  ;;  %v48_v25 = vsub.f32 %v44_v23, %v46_v22 }
  0x99   :  { %v50_v26 = vmax.f32 %v48_v25, 0.0  ;;  %283 = vrsqrt.f32 %v53_v24 }
  0x9b   :  { %v54_v27 = vadd.f32 1e-05, %v50_v26 }
  0x9d   :  { %285 = vrsqrt.f32 %v54_v27 }
  0xa6   :  { %v284_v28 = vpop.eup %283 }
  0xa7   :  { %v57_v32 = vmul.f32 %v284_v28, %v51_v29 }
  0xaa   :  { %v286_v31 = vpop.eup %285 }
  0xab   :  { %v58_v33 = vmul.f32 %v286_v31, %v52_v30 }
  0xad   :  { %v59_v34 = vpack.c.bf16 %v58_v33, %v57_v32 }
  0xaf   :  { %266 = vmatmul.mubr.msk.bf16.vlgmr.msra.gmra.mxu0 %vm25_vm0, %v59_v34 }
 0x16f   :  { %v120_v36 = vpop.f32.mrf.mxu0 }
 0x170   :  { %v121_v37 = vadd.f32 %v243_v35, %v120_v36 }
 0x171   :  { %v267_v38 = vpop.f32.mrf.mxu0 }
 0x172   :  { %v129_v39 = vmul.f32 0.70710677, %v121_v37  ;;  %v127_v45 = vmul.f32 0.5, %v121_v37 }
 0x173   :  { %v123_v40 = vpop.f32.mrf.mxu0 }
 0x174   :  { %287 = verf.f32 %v129_v39  ;;  %v124_v41 = vadd.f32 %v243_v35, %v123_v40 }
 0x175   :  { %v268_v42 = vpop.f32.mrf.mxu0 }
 0x176   :  { %v130_v43 = vmul.f32 0.70710677, %v124_v41  ;;  %v128_v49 = vmul.f32 0.5, %v124_v41 }
 0x178   :  { %289 = verf.f32 %v130_v43 }
 0x181   :  { %v288_v44 = vpop.eup %287 }
 0x182   :  { %v133_v46 = vadd.f32 1.0, %v288_v44 }
 0x184   :  { %v135_v47 = vmul.f32 %v133_v46, %v127_v45 }
 0x185   :  { %v290_v48 = vpop.eup %289 }
 0x186   :  { %v134_v50 = vadd.f32 1.0, %v290_v48  ;;  %v137_v51 = vsel %vm25_vm0, %v135_v47, 0.0  ;;  %v145_v52 = vmul.f32 %v135_v47, %v135_v47 }
 0x187   :  { %138 = vadd.xlane.f32.xlu0 %v137_v51 }
 0x188   :  { %v136_v53 = vmul.f32 %v134_v50, %v128_v49  ;;  %v147_v54 = vsel %vm25_vm0, %v145_v52, 0.0 }
 0x18a   :  { %v140_v55 = vsel %vm25_vm0, %v136_v53, 0.0  ;;  %v146_v56 = vmul.f32 %v136_v53, %v136_v53 }
 0x18b   :  { %148 = vadd.xlane.f32.xlu0 %v147_v54  ;;  %141 = vadd.xlane.f32.xlu1 %v140_v55 }
 0x18c   :  { %v150_v57 = vsel %vm25_vm0, %v146_v56, 0.0 }
 0x18f   :  { %151 = vadd.xlane.f32.xlu1 %v150_v57 }
 0x210   :  { %v139_v60 = vpop.xlane.xlu0 %138 }
 0x211   :  { %v143_v61 = vmul.f32 0.03125, %v139_v60 }
 0x213   :  { %v155_v0 = vmul.f32 %v143_v61, %v143_v61  ;;  %v161_v13 = vsub.f32 %v135_v47, %v143_v61 }
 0x214   :  { %v149_v62 = vpop.xlane.xlu0 %148  ;;  %v142_v63 = vpop.xlane.xlu1 %141 }
 0x215   :  { %v153_v1 = vmul.f32 0.03125, %v149_v62  ;;  %v144_v2 = vmul.f32 0.03125, %v142_v63 }
 0x217   :  { %v157_v3 = vsub.f32 %v153_v1, %v155_v0  ;;  %v156_v6 = vmul.f32 %v144_v2, %v144_v2  ;;  %v162_v14 = vsub.f32 %v136_v53, %v144_v2 }
 0x218   :  { %v152_v4 = vpop.xlane.xlu1 %151 }
 0x219   :  { %v159_v5 = vmax.f32 %v157_v3, 0.0  ;;  %v154_v7 = vmul.f32 0.03125, %v152_v4 }
 0x21b   :  { %v163_v8 = vadd.f32 1e-05, %v159_v5  ;;  %v158_v10 = vsub.f32 %v154_v7, %v156_v6 }
 0x21d   :  { %v160_v11 = vmax.f32 %v158_v10, 0.0  ;;  %291 = vrsqrt.f32 %v163_v8 }
 0x21f   :  { %v164_v12 = vadd.f32 1e-05, %v160_v11 }
 0x221   :  { %293 = vrsqrt.f32 %v164_v12 }
 0x22a   :  { %v292_v9 = vpop.eup %291 }
 0x22b   :  { %v167_v16 = vmul.f32 %v292_v9, %v161_v13 }
 0x22e   :  { %v294_v15 = vpop.eup %293 }
 0x22f   :  { %v168_v17 = vmul.f32 %v294_v15, %v162_v14 }
 0x231   :  { %v169_v18 = vpack.c.bf16 %v168_v17, %v167_v16 }
 0x233   :  { %274 = vmatmul.mubr.msk.bf16.vlgmr.msra.gmra.mxu1 %vm25_vm0, %v169_v18 }
 0x2f3   :  { %v230_v20 = vpop.f32.mrf.mxu1 }
 0x2f4   :  { %v231_v21 = vadd.f32 %v247_v19, %v230_v20 }
 0x2f5   :  { %v275_v22 = vpop.f32.mrf.mxu1 }
 0x2f6   :  { %237 = vst [vmem:[%s375_s5] sm:$0xff] %v231_v21 }
 0x2f7   :  { %v233_v23 = vpop.f32.mrf.mxu1 }
 0x2f8   :  { %v234_v24 = vadd.f32 %v247_v19, %v233_v23 }
 0x2f9   :  { %v276_v25 = vpop.f32.mrf.mxu1 }
 0x2fa   :  { %238 = vst [vmem:[%s375_s5 + $0x8] sm:$0xff] %v234_v24 }

</bundles_post_ra>
